<compile_context>
chip_gen: v7x
topology: tpu7x:2x2x1
jax: 0.10.0
libtpu: 0.0.40
codegen_flags: <defaults>
</compile_context>

<pallas_src>
import functools

import jax
import jax.numpy as jnp
from jax.experimental import pallas as pl
from jax.experimental.pallas import tpu as pltpu


# ----------------------------------------------------------------------------
# Host-side, one-time parameter packing (PyTorch nn.GRUCell layout in).
# ----------------------------------------------------------------------------
def pack_gru_params(w_ih, w_hh, b_ih, b_hh, *, matmul_dtype=jnp.bfloat16):
    """Pack PyTorch GRUCell params for the fused kernels.

    w_ih : (3H, D_in), w_hh : (3H, H), b_ih/b_hh : (3H,)
    Returns:
      wx  : (D_in, 3H) bf16, columns [ w_ir | -w_iz | w_in ]
      wh  : (H,    3H) bf16, columns [ w_hr | -w_hz | w_hn ]
      bx  : (1, 3H) f32,  [ b_ir+b_hr | -(b_iz+b_hz) | b_in ]
      bhn : (1, H)  f32,  b_hn   (stays inside r*(h_n + b_hn))
    The z columns are pre-negated so sigmoid of the packed z pre-activation
    directly yields (1 - z)  (since sigmoid(-a) = 1 - sigmoid(a)).
    """
    H = w_hh.shape[1]
    w_ir, w_iz, w_in = w_ih[:H], w_ih[H:2 * H], w_ih[2 * H:]
    w_hr, w_hz, w_hn = w_hh[:H], w_hh[H:2 * H], w_hh[2 * H:]

    wx = jnp.concatenate([w_ir.T, -w_iz.T, w_in.T], axis=1).astype(matmul_dtype)
    wh = jnp.concatenate([w_hr.T, -w_hz.T, w_hn.T], axis=1).astype(matmul_dtype)

    bx = jnp.concatenate([
        b_ih[:H] + b_hh[:H],                        # r gate (pre-summed)
        -(b_ih[H:2 * H] + b_hh[H:2 * H]),           # z gate (pre-summed, negated)
        b_ih[2 * H:],                               # i_n bias
    ]).reshape(1, 3 * H).astype(jnp.float32)
    bhn = b_hh[2 * H:].reshape(1, H).astype(jnp.float32)
    return wx, wh, bx, bhn


# ----------------------------------------------------------------------------
# Kernels
# ----------------------------------------------------------------------------
def _gru_dh_kernel(x_ref, h_ref, wx_ref, wh_ref, bx_ref, bhn_ref, o_ref, *,
                   hidden):
    """Single derivative eval: o = GRUCell(x, h) - h == (1-z) * (n - h)."""
    H = hidden
    h = h_ref[...]                                                # (TB, H) f32

    # Two direct MXU dots (bf16 operands, f32 accumulate); no lane concat,
    # no zero-padded weight columns.
    gx = jnp.dot(x_ref[...].astype(jnp.bfloat16), wx_ref[...],
                 preferred_element_type=jnp.float32) + bx_ref[...]
    gh = jnp.dot(h.astype(jnp.bfloat16), wh_ref[...],
                 preferred_element_type=jnp.float32)

    # One sigmoid over 2H lanes yields [r | 1-z] (z columns are pre-negated).
    srz = jax.nn.sigmoid(gx[:, :2 * H] + gh[:, :2 * H])
    r, omz = srz[:, :H], srz[:, H:]
    n = jnp.tanh(gx[:, 2 * H:] + r * (gh[:, 2 * H:] + bhn_ref[...]))

    o_ref[...] = (omz * (n - h)).astype(o_ref.dtype)              # h_new - h


def _gru_euler_kernel(x_ref, h0_ref, wx_ref, wh_ref, bx_ref, bhn_ref, o_ref,
                      h_acc, gx_acc, *, hidden, dt):
    """Fused explicit-Euler ODE solve: h <- h + dt * (GRUCell(x,h) - h).

    Grid = (batch_tiles [parallel], num_steps [arbitrary]).  h lives in VMEM
    scratch across the time axis; the x-side gate matmul is hoisted to t==0.
    """
    H = hidden
    t = pl.program_id(1)

    @pl.when(t == 0)
    def _init():
        h_acc[...] = h0_ref[...]
        gx_acc[...] = jnp.dot(x_ref[...].astype(jnp.bfloat16), wx_ref[...],
                              preferred_element_type=jnp.float32) + bx_ref[...]

    h = h_acc[...]
    gx = gx_acc[...]
    gh = jnp.dot(h.astype(jnp.bfloat16), wh_ref[...],
                 preferred_element_type=jnp.float32)

    srz = jax.nn.sigmoid(gx[:, :2 * H] + gh[:, :2 * H])
    r, omz = srz[:, :H], srz[:, H:]
    n = jnp.tanh(gx[:, 2 * H:] + r * (gh[:, 2 * H:] + bhn_ref[...]))

    h_acc[...] = h + dt * (omz * (n - h))

    @pl.when(t == pl.num_programs(1) - 1)
    def _finalize():
        o_ref[...] = h_acc[...].astype(o_ref.dtype)


# ----------------------------------------------------------------------------
# Wrappers
# ----------------------------------------------------------------------------
def _pick_batch_tile(batch):
    # Whole batch if modest (one grid step, zero per-step overhead); otherwise
    # large 1024-row tiles so the ~0.35us per-grid-step overhead is amortized
    # and v7x's 2 TensorCores both get work on the "parallel" batch axis.
    return batch if batch <= 1024 else 1024


def _pad_rows(a, rows):
    return a if a.shape[0] == rows else jnp.pad(a, ((0, rows - a.shape[0]), (0, 0)))


def ode_func_forward(x, h, wx, wh, bx, bhn):
    """ODE_Func.forward(t, h) = GRUCell(x, h) - h, with pre-packed weights."""
    B, D_in = x.shape
    _, H = h.shape
    assert wx.shape == (D_in, 3 * H) and wh.shape == (H, 3 * H)

    TB = _pick_batch_tile(B)
    Bp = pl.cdiv(B, TB) * TB
    xp, hp = _pad_rows(x, Bp), _pad_rows(h, Bp)

    cost = pl.CostEstimate(
        flops=2 * Bp * 3 * H * (D_in + H) + 12 * Bp * H,
        transcendentals=3 * Bp * H,
        bytes_accessed=4 * (xp.size + hp.size + Bp * H + bx.size + bhn.size)
        + 2 * (wx.size + wh.size),
    )

    kernel = functools.partial(_gru_dh_kernel, hidden=H)
    out = pl.pallas_call(
        kernel,
        out_shape=jax.ShapeDtypeStruct((Bp, H), jnp.float32),
        grid=(Bp // TB,),
        in_specs=[
            pl.BlockSpec((TB, D_in), lambda i: (i, 0)),      # x tile
            pl.BlockSpec((TB, H), lambda i: (i, 0)),         # h tile
            pl.BlockSpec((D_in, 3 * H), lambda i: (0, 0)),   # Wx (resident)
            pl.BlockSpec((H, 3 * H), lambda i: (0, 0)),      # Wh (resident)
            pl.BlockSpec((1, 3 * H), lambda i: (0, 0)),      # bx
            pl.BlockSpec((1, H), lambda i: (0, 0)),          # b_hn
        ],
        out_specs=pl.BlockSpec((TB, H), lambda i: (i, 0)),
        compiler_params=pltpu.CompilerParams(
            dimension_semantics=("parallel",)),
        cost_estimate=cost,
    )(xp, hp, wx, wh, bx, bhn)
    return out[:B]


def ode_func_euler_fused(x, h0, wx, wh, bx, bhn, *, num_steps, dt):
    """Fused explicit-Euler solve of dh/dt = GRUCell(x,h) - h over num_steps.

    The integrator time loop is folded into the pallas_call (time axis is
    'arbitrary', h carried in VMEM scratch), eliminating per-step launch
    overhead and the per-step HBM round trip of h.
    """
    B, D_in = x.shape
    _, H = h0.shape

    TB = _pick_batch_tile(B)
    Bp = pl.cdiv(B, TB) * TB
    xp, hp = _pad_rows(x, Bp), _pad_rows(h0, Bp)

    cost = pl.CostEstimate(
        flops=2 * Bp * 3 * H * H * num_steps + 2 * Bp * 3 * H * D_in
        + 14 * Bp * H * num_steps,
        transcendentals=3 * Bp * H * num_steps,
        bytes_accessed=4 * (xp.size + hp.size + Bp * H + bx.size + bhn.size)
        + 2 * (wx.size + wh.size),
    )

    kernel = functools.partial(_gru_euler_kernel, hidden=H, dt=float(dt))
    out = pl.pallas_call(
        kernel,
        out_shape=jax.ShapeDtypeStruct((Bp, H), jnp.float32),
        grid=(Bp // TB, num_steps),
        in_specs=[
            pl.BlockSpec((TB, D_in), lambda i, t: (i, 0)),     # x tile (const in t)
            pl.BlockSpec((TB, H), lambda i, t: (i, 0)),        # h0 tile
            pl.BlockSpec((D_in, 3 * H), lambda i, t: (0, 0)),  # Wx (resident)
            pl.BlockSpec((H, 3 * H), lambda i, t: (0, 0)),     # Wh (resident)
            pl.BlockSpec((1, 3 * H), lambda i, t: (0, 0)),     # bx
            pl.BlockSpec((1, H), lambda i, t: (0, 0)),         # b_hn
        ],
        out_specs=pl.BlockSpec((TB, H), lambda i, t: (i, 0)),
        scratch_shapes=[
            pltpu.VMEM((TB, H), jnp.float32),        # h accumulator
            pltpu.VMEM((TB, 3 * H), jnp.float32),    # hoisted x-side gates
        ],
        compiler_params=pltpu.CompilerParams(
            dimension_semantics=("parallel", "arbitrary")),
        cost_estimate=cost,
    )(xp, hp, wx, wh, bx, bhn)
    return out[:B]


# ----------------------------------------------------------------------------
# Pure-JAX references (PyTorch nn.GRUCell math)
# ----------------------------------------------------------------------------
def _reference_dh(x, h, w_ih, w_hh, b_ih, b_hh):
    H = h.shape[-1]
    gi = x @ w_ih.T + b_ih
    gh = h @ w_hh.T + b_hh
    i_r, i_z, i_n = gi[:, :H], gi[:, H:2 * H], gi[:, 2 * H:]
    h_r, h_z, h_n = gh[:, :H], gh[:, H:2 * H], gh[:, 2 * H:]
    r = jax.nn.sigmoid(i_r + h_r)
    z = jax.nn.sigmoid(i_z + h_z)
    n = jnp.tanh(i_n + r * h_n)
    h_new = (1.0 - z) * n + z * h
    return h_new - h


if __name__ == "__main__":
    # Small deterministic shapes: batch=8, input_size=32, hidden_size=32.
    B, D_IN, HID = 8, 32, 32
    key = jax.random.PRNGKey(0)
    kx, kh, k1, k2, k3, k4 = jax.random.split(key, 6)

    x = jax.random.normal(kx, (B, D_IN), dtype=jnp.float32)
    h = jax.random.normal(kh, (B, HID), dtype=jnp.float32)

    # PyTorch-style GRUCell init: U(-stdv, stdv), stdv = 1/sqrt(hidden).
    stdv = 1.0 / jnp.sqrt(jnp.float32(HID))
    w_ih = jax.random.uniform(k1, (3 * HID, D_IN), jnp.float32, -stdv, stdv)
    w_hh = jax.random.uniform(k2, (3 * HID, HID), jnp.float32, -stdv, stdv)
    b_ih = jax.random.uniform(k3, (3 * HID,), jnp.float32, -stdv, stdv)
    b_hh = jax.random.uniform(k4, (3 * HID,), jnp.float32, -stdv, stdv)

    # One-time packing (module-init time in a real ODE solve).
    wx, wh, bx, bhn = jax.block_until_ready(
        pack_gru_params(w_ih, w_hh, b_ih, b_hh))

    # --- Module forward semantics: single derivative evaluation ------------
    out = jax.block_until_ready(ode_func_forward(x, h, wx, wh, bx, bhn))
    ref = _reference_dh(x, h, w_ih, w_hh, b_ih, b_hh)
    assert out.shape == (B, HID)
    # bf16 matmul inputs -> loosened tolerance (gate math stays f32).
    assert jnp.allclose(out, ref, atol=2e-2, rtol=2e-2), "forward mismatch"

    # --- Fused integrator (time loop inside the kernel) ---------------------
    T_STEPS, DT = 8, 0.1
    h_T = jax.block_until_ready(
        ode_func_euler_fused(x, h, wx, wh, bx, bhn, num_steps=T_STEPS, dt=DT))
    h_ref = h
    for _ in range(T_STEPS):
        h_ref = h_ref + DT * _reference_dh(x, h_ref, w_ih, w_hh, b_ih, b_hh)
    assert h_T.shape == (B, HID)
    assert jnp.allclose(h_T, h_ref, atol=3e-2, rtol=3e-2), "euler mismatch"

    print("KERNEL_OK")
</pallas_src>

<mosaic_0001>
module attributes {stable_mosaic.version = 11 : i64} {
  func.func @_gru_dh_kernel(%arg0: i32, %arg1: memref<8x32xf32, #tpu.memory_space<vmem>>, %arg2: memref<8x32xf32, #tpu.memory_space<vmem>>, %arg3: memref<32x96xbf16, #tpu.memory_space<vmem>>, %arg4: memref<32x96xbf16, #tpu.memory_space<vmem>>, %arg5: memref<1x96xf32, #tpu.memory_space<vmem>>, %arg6: memref<1x32xf32, #tpu.memory_space<vmem>>, %arg7: memref<8x32xf32, #tpu.memory_space<vmem>>) attributes {dimension_semantics = [#tpu.dimension_semantics<parallel>], iteration_bounds = array<i64: 1>, scalar_prefetch = 0 : i64, scratch_operands = 0 : i64, tpu.core_type = #tpu.core_type<tc>, window_params = [{transform_indices = @transform_0, window_bounds = array<i64: 8, 32>}, {transform_indices = @transform_1, window_bounds = array<i64: 8, 32>}, {pipeline_mode = #tpu.pipeline_mode<synchronous>, transform_indices = @transform_2, window_bounds = array<i64: 32, 96>}, {pipeline_mode = #tpu.pipeline_mode<synchronous>, transform_indices = @transform_3, window_bounds = array<i64: 32, 96>}, {pipeline_mode = #tpu.pipeline_mode<synchronous>, transform_indices = @transform_4, window_bounds = array<i64: 1, 96>}, {pipeline_mode = #tpu.pipeline_mode<synchronous>, transform_indices = @transform_5, window_bounds = array<i64: 1, 32>}, {transform_indices = @transform_6, window_bounds = array<i64: 8, 32>}]} {
    %c0 = arith.constant 0 : index
    %c0_0 = arith.constant 0 : index
    %0 = vector.load %arg2[%c0, %c0_0] : memref<8x32xf32, #tpu.memory_space<vmem>>, vector<8x32xf32>
    %c0_1 = arith.constant 0 : index
    %c0_2 = arith.constant 0 : index
    %1 = vector.load %arg1[%c0_1, %c0_2] : memref<8x32xf32, #tpu.memory_space<vmem>>, vector<8x32xf32>
    %2 = arith.truncf %1 : vector<8x32xf32> to vector<8x32xbf16>
    %c0_3 = arith.constant 0 : index
    %c0_4 = arith.constant 0 : index
    %3 = vector.load %arg3[%c0_3, %c0_4] : memref<32x96xbf16, #tpu.memory_space<vmem>>, vector<32x96xbf16>
    %cst = arith.constant dense<0.000000e+00> : vector<8x96xf32>
    %4 = tpu.matmul %2, %3, %cst {dimension_numbers = #tpu.dot_dimension_numbers<[1], [0], [0], [1], [0, 0, 1, 1], [], []>} : vector<8x32xbf16>, vector<32x96xbf16>, vector<8x96xf32> -> vector<8x96xf32>
    %c0_5 = arith.constant 0 : index
    %c0_6 = arith.constant 0 : index
    %5 = vector.load %arg5[%c0_5, %c0_6] : memref<1x96xf32, #tpu.memory_space<vmem>>, vector<1x96xf32>
    %6 = vector.broadcast %5 : vector<1x96xf32> to vector<8x96xf32>
    %7 = arith.addf %4, %6 : vector<8x96xf32>
    %8 = arith.truncf %0 : vector<8x32xf32> to vector<8x32xbf16>
    %c0_7 = arith.constant 0 : index
    %c0_8 = arith.constant 0 : index
    %9 = vector.load %arg4[%c0_7, %c0_8] : memref<32x96xbf16, #tpu.memory_space<vmem>>, vector<32x96xbf16>
    %cst_9 = arith.constant dense<0.000000e+00> : vector<8x96xf32>
    %10 = tpu.matmul %8, %9, %cst_9 {dimension_numbers = #tpu.dot_dimension_numbers<[1], [0], [0], [1], [0, 0, 1, 1], [], []>} : vector<8x32xbf16>, vector<32x96xbf16>, vector<8x96xf32> -> vector<8x96xf32>
    %11 = vector.extract_strided_slice %7 {offsets = [0, 0], sizes = [8, 64], strides = [1, 1]} : vector<8x96xf32> to vector<8x64xf32>
    %12 = vector.extract_strided_slice %10 {offsets = [0, 0], sizes = [8, 64], strides = [1, 1]} : vector<8x96xf32> to vector<8x64xf32>
    %13 = arith.addf %11, %12 : vector<8x64xf32>
    %14 = arith.negf %13 : vector<8x64xf32>
    %15 = math.exp %14 : vector<8x64xf32>
    %cst_10 = arith.constant 1.000000e+00 : f32
    %16 = vector.broadcast %cst_10 : f32 to vector<8x64xf32>
    %17 = arith.addf %16, %15 : vector<8x64xf32>
    %18 = arith.divf %16, %17 : vector<8x64xf32>
    %19 = vector.extract_strided_slice %18 {offsets = [0, 0], sizes = [8, 32], strides = [1, 1]} : vector<8x64xf32> to vector<8x32xf32>
    %20 = vector.extract_strided_slice %18 {offsets = [0, 32], sizes = [8, 32], strides = [1, 1]} : vector<8x64xf32> to vector<8x32xf32>
    %21 = vector.extract_strided_slice %7 {offsets = [0, 64], sizes = [8, 32], strides = [1, 1]} : vector<8x96xf32> to vector<8x32xf32>
    %22 = vector.extract_strided_slice %10 {offsets = [0, 64], sizes = [8, 32], strides = [1, 1]} : vector<8x96xf32> to vector<8x32xf32>
    %c0_11 = arith.constant 0 : index
    %c0_12 = arith.constant 0 : index
    %23 = vector.load %arg6[%c0_11, %c0_12] : memref<1x32xf32, #tpu.memory_space<vmem>>, vector<1x32xf32>
    %24 = vector.broadcast %23 : vector<1x32xf32> to vector<8x32xf32>
    %25 = arith.addf %22, %24 : vector<8x32xf32>
    %26 = arith.mulf %19, %25 : vector<8x32xf32>
    %27 = arith.addf %21, %26 : vector<8x32xf32>
    %28 = math.tanh %27 : vector<8x32xf32>
    %29 = arith.subf %28, %0 : vector<8x32xf32>
    %30 = arith.mulf %20, %29 : vector<8x32xf32>
    %c0_13 = arith.constant 0 : index
    %c0_14 = arith.constant 0 : index
    %31 = vector.load %arg7[%c0_13, %c0_14] : memref<8x32xf32, #tpu.memory_space<vmem>>, vector<8x32xf32>
    tpu.vector_store %arg7[%c0_13, %c0_14], %30 {strides = array<i32>} : memref<8x32xf32, #tpu.memory_space<vmem>>, vector<8x32xf32>,
    return
  }
  func.func @transform_0(%arg0: i32) -> (i32, i32) {
    %c0_i32 = arith.constant 0 : i32
    %c0_i32_0 = arith.constant 0 : i32
    return %arg0, %c0_i32 : i32, i32
  }
  func.func @transform_1(%arg0: i32) -> (i32, i32) {
    %c0_i32 = arith.constant 0 : i32
    %c0_i32_0 = arith.constant 0 : i32
    return %arg0, %c0_i32 : i32, i32
  }
  func.func @transform_2(%arg0: i32) -> (i32, i32) {
    %c0_i32 = arith.constant 0 : i32
    %c0_i32_0 = arith.constant 0 : i32
    %c0_i32_1 = arith.constant 0 : i32
    return %c0_i32, %c0_i32_0 : i32, i32
  }
  func.func @transform_3(%arg0: i32) -> (i32, i32) {
    %c0_i32 = arith.constant 0 : i32
    %c0_i32_0 = arith.constant 0 : i32
    %c0_i32_1 = arith.constant 0 : i32
    return %c0_i32, %c0_i32_0 : i32, i32
  }
  func.func @transform_4(%arg0: i32) -> (i32, i32) {
    %c0_i32 = arith.constant 0 : i32
    %c0_i32_0 = arith.constant 0 : i32
    %c0_i32_1 = arith.constant 0 : i32
    return %c0_i32, %c0_i32_0 : i32, i32
  }
  func.func @transform_5(%arg0: i32) -> (i32, i32) {
    %c0_i32 = arith.constant 0 : i32
    %c0_i32_0 = arith.constant 0 : i32
    %c0_i32_1 = arith.constant 0 : i32
    return %c0_i32, %c0_i32_0 : i32, i32
  }
  func.func @transform_6(%arg0: i32) -> (i32, i32) {
    %c0_i32 = arith.constant 0 : i32
    %c0_i32_0 = arith.constant 0 : i32
    return %arg0, %c0_i32 : i32, i32
  }
}

</mosaic_0001>

<bundles_post_ra>
// kernel: tpu_custom_call.1
= control target key start
LH: loop header
LB: loop body
LE: loop exit
PB: predicated region body
PF: predicated region fallthrough
CT: control target
= control target key end

     0   :  { %11 = vsyncpa [#allocation3], 0  ;;  %s557_s0 = inlined_call_operand.hbm [shape: f32[8,32], index: 0, kind: input, shape index: {}]   ;;  %s558_s1 = inlined_call_operand.hbm [shape: f32[8,32], index: 1, kind: input, shape index: {}]   ;;  %s559_s2 = inlined_call_operand.hbm [shape: bf16[32,96], index: 2, kind: input, shape index: {}]   ;;  %s560_s3 = inlined_call_operand.hbm [shape: bf16[32,96], index: 3, kind: input, shape index: {}]   ;;  %s561_s4 = inlined_call_operand.vmem [shape: f32[1,96], index: 4, kind: input, shape index: {}]   ;;  %s562_s5 = inlined_call_operand.vmem [shape: f32[1,32], index: 5, kind: input, shape index: {}]   ;;  %s563_s6 = inlined_call_operand.hbm [shape: f32[8,32], index: 6, kind: output, shape index: {}]  }
   0x1   :  { %12 = vsyncpa [#allocation6], 0 }
   0x2   :  { %13 = vsyncpa [#allocation9], 0 }
   0x3   :  { %14 = vsyncpa [#allocation4], 0  ;;  %s435_s21 = smov [#allocation5]   ;;  %s436_s23 = smov [#allocation2]  }
   0x4   :  { %s31_s22 = sshll.u32 %s435_s21, 4  ;;  %s21_s24 = sshll.u32 %s436_s23, 4  ;;  %s32_s22 = int_to_ptr.vmem [resolvable:$true] %s31_s22  ;;  %s22_s24 = int_to_ptr.vmem [resolvable:$true] %s21_s24 }
   0x5   :  { %s317_s27 = scalar_lea.hbm %s558_s1, 128 }
   0x6   :  { %p318_p0 = scmp.ne.s32.totalorder %s558_s1, %s317_s27  ;;  %p321_p1 = scmp.lt.u32.totalorder %s317_s27, %s558_s1 }
   0x8   :  { %p323_p2 = pnand %p321_p1, %p318_p0 }
   0xa   :  { %326 = shalt.err (!%p323_p2)
}
   0xb   :  { %s327_s8 = scalar_lea.vmem %s32_s22, 128  ;;  %p332_p4 = scmp.lt.s32.totalorder %s32_s22, %s32_s22 }
   0xc   :  { %p328_p3 = scmp.ne.s32.totalorder %s32_s22, %s327_s8  ;;  %p333_p5 = scmp.lt.s32.totalorder %s327_s8, %s327_s8 }
   0xe   :  { %p334_p6 = por %p333_p5, %p332_p4 }
  0x10   :  { %p335_p7 = pnand %p334_p6, %p328_p3 }
  0x12   :  { %338 = shalt.err (!%p335_p7)
}
  0x13   :  { %34 = dma.hbm_to_vmem [thread:$0]  %s558_s1, 128, %s32_s22, [#allocation6]  }
  0x14   :  { %s339_s13 = scalar_lea.hbm %s557_s0, 128 }
  0x15   :  { %p340_p8 = scmp.ne.s32.totalorder %s557_s0, %s339_s13  ;;  %p343_p9 = scmp.lt.u32.totalorder %s339_s13, %s557_s0 }
  0x17   :  { %p345_p10 = pnand %p343_p9, %p340_p8 }
  0x19   :  { %348 = shalt.err (!%p345_p10)
}
  0x1a   :  { %s349_s18 = scalar_lea.vmem %s22_s24, 128  ;;  %p354_p12 = scmp.lt.s32.totalorder %s22_s24, %s22_s24 }
  0x1b   :  { %p350_p11 = scmp.ne.s32.totalorder %s22_s24, %s349_s18  ;;  %p355_p13 = scmp.lt.s32.totalorder %s349_s18, %s349_s18 }
  0x1d   :  { %p356_p0 = por %p355_p13, %p354_p12 }
  0x1f   :  { %p357_p1 = pnand %p356_p0, %p350_p11 }
  0x21   :  { %360 = shalt.err (!%p357_p1)
}
  0x22   :  { %24 = dma.hbm_to_vmem [thread:$0]  %s557_s0, 128, %s22_s24, [#allocation3]  }
  0x23   :  { %s437_s20 = smov [#allocation7]   ;;  %s361_s25 = scalar_lea.hbm %s559_s2, 256 }
  0x24   :  { %s40_s21 = sshll.u32 %s437_s20, 4  ;;  %p362_p2 = scmp.ne.s32.totalorder %s559_s2, %s361_s25  ;;  %s41_s21 = int_to_ptr.vmem [resolvable:$true] %s40_s21 }
  0x25   :  { %p365_p3 = scmp.lt.u32.totalorder %s361_s25, %s559_s2 }
  0x27   :  { %p367_p4 = pnand %p365_p3, %p362_p2 }
  0x29   :  { %370 = shalt.err (!%p367_p4)
}
  0x2a   :  { %s371_s30 = scalar_lea.vmem %s41_s21, 256  ;;  %p376_p6 = scmp.lt.s32.totalorder %s41_s21, %s41_s21 }
  0x2b   :  { %p372_p5 = scmp.ne.s32.totalorder %s41_s21, %s371_s30  ;;  %p377_p7 = scmp.lt.s32.totalorder %s371_s30, %s371_s30 }
  0x2d   :  { %p378_p8 = por %p377_p7, %p376_p6 }
  0x2f   :  { %p379_p9 = pnand %p378_p8, %p372_p5 }
  0x31   :  { %382 = shalt.err (!%p379_p9)
}
  0x32   :  { %s438_s0 = smov 64   ;;  %s439_s24 = smov 4  }
  0x33   :  { %46 = dma.hbm_to_vmem [thread:$0]  %s559_s2, 256, %s41_s21, [#allocation6], %s438_s0, %s438_s0, %s439_s24  }
  0x34   :  { %s440_s9 = smov [#allocation8]   ;;  %s383_s13 = scalar_lea.hbm %s560_s3, 256 }
  0x35   :  { %s52_s10 = sshll.u32 %s440_s9, 4  ;;  %p384_p10 = scmp.ne.s32.totalorder %s560_s3, %s383_s13  ;;  %s53_s10 = int_to_ptr.vmem [resolvable:$true] %s52_s10 }
  0x36   :  { %p387_p11 = scmp.lt.u32.totalorder %s383_s13, %s560_s3 }
  0x38   :  { %p389_p12 = pnand %p387_p11, %p384_p10 }
  0x3a   :  { %392 = shalt.err (!%p389_p12)
}
  0x3b   :  { %s393_s18 = scalar_lea.vmem %s53_s10, 256  ;;  %p398_p0 = scmp.lt.s32.totalorder %s53_s10, %s53_s10 }
  0x3c   :  { %p394_p13 = scmp.ne.s32.totalorder %s53_s10, %s393_s18  ;;  %p399_p1 = scmp.lt.s32.totalorder %s393_s18, %s393_s18 }
  0x3e   :  { %p400_p2 = por %p399_p1, %p398_p0 }
  0x40   :  { %p401_p3 = pnand %p400_p2, %p394_p13 }
  0x42   :  { %404 = shalt.err (!%p401_p3)
}
  0x43   :  { %58 = dma.hbm_to_vmem [thread:$0]  %s560_s3, 256, %s53_s10, [#allocation9], %s438_s0, %s438_s0, %s439_s24  }
  0x44   :  { %427 = dma.done.wait [#allocation3], 128  }
  0x45   :  { %428 = vsyncadd [#allocation3], 4294967168 }
  0x46   :  { %429 = dma.done.wait [#allocation6], 384  }
  0x47   :  { %430 = vsyncadd [#allocation6], 4294966912 }
  0x48   :  { %431 = dma.done.wait [#allocation9], 256  }
  0x49   :  { %432 = vsyncadd [#allocation9], 4294967040  ;;  %v441_v0 = vmov 0.0   ;;  %vm442_vm0 = vmmov 0   ;;  %v307_v1 = vld [vmem:[#allocation7] sm:$0xff]   ;;  %v308_v2 = vld [vmem:[#allocation8] sm:$0xff]  }
  0x4a   :  { %281 = vmatprep.subr.bf16.mxu0 %v441_v0  ;;  %289 = vmatprep.subr.bf16.mxu1 %v441_v0  ;;  %v309_v3 = vld [vmem:[#allocation7 + $0x8] sm:$0xff]   ;;  %v310_v4 = vld [vmem:[#allocation8 + $0x8] sm:$0xff]   ;;  %v77_v5 = vld [vmem:[#allocation2] sm:$0xff]  ;;  %vm102_vm1 = vcmask 261120   ;;  %s444_s21 = smov [#allocation10]  }
  0x4b   :  { %285 = vmatprep.mubr.msk.bf16.mxu0 %vm442_vm0, %v441_v0  ;;  %293 = vmatprep.mubr.msk.bf16.mxu1 %vm442_vm0, %v441_v0  ;;  %v76_v6 = vld [vmem:[#allocation5] sm:$0xff]  ;;  %v274_v7 = vld [vmem:[%s562_s5] ss:$0 sm:$0xff]  ;;  %v78_v8 = vpack.c.bf16 %v77_v5, %v77_v5  ;;  %s255_s22 = sshll.u32 %s444_s21, 4  ;;  %s256_s22 = int_to_ptr.vmem [resolvable:$true] %s255_s22 }
  0x4c   :  { %282 = vmatpush3.bf16.msra.mxu0 %v307_v1  ;;  %290 = vmatpush3.bf16.msra.mxu1 %v308_v2  ;;  %v146_v9 = vpack.c.bf16 %v76_v6, %v76_v6  ;;  %v266_v20 = vld [vmem:[%s561_s4] ss:$0 sm:$0xff]  ;;  %s443_s4 = smov 96   ;;  %s405_s23 = scalar_lea.vmem %s256_s22, 128 }
  0x4d   :  { %283 = vmatprep.subr.bf16.mxu0 %v441_v0  ;;  %291 = vmatprep.subr.bf16.mxu1 %v441_v0  ;;  %p406_p4 = scmp.ne.s32.totalorder %s256_s22, %s405_s23  ;;  %p410_p5 = scmp.lt.s32.totalorder %s256_s22, %s256_s22 }
  0x4e   :  { %219 = vrot.lane.b32.xlu0 %v274_v7, %s438_s0  ;;  %p411_p6 = scmp.lt.s32.totalorder %s405_s23, %s405_s23 }
  0x50   :  { %284 = vmatpush3.bf16.msra.mxu0 %v309_v3  ;;  %292 = vmatpush3.bf16.msra.mxu1 %v310_v4  ;;  %p412_p7 = por %p411_p6, %p410_p5 }
  0x52   :  { %p413_p8 = pnand %p412_p7, %p406_p4 }
  0x53   :  { %286 = vmatmul.mubr.msk.bf16.vlgmr.msra.gmra.mrb[0].mxu0 %vm102_vm1, %v78_v8  ;;  %294 = vmatmul.mubr.msk.bf16.vlgmr.msra.gmra.mrb[0].mxu1 %vm102_vm1, %v146_v9 }
  0xc0   :  { %v220_v10 = vpop.permute.xlu0 %219 }
 0x126   :  { %v140_v11 = vpop.f32.mrb[0].mxu0  ;;  %v200_v12 = vpop.f32.mrb[0].mxu1 }
 0x127   :  { %v287_v13 = vpop.f32.mrb[1].mxu0  ;;  %v295_v14 = vpop.f32.mrb[1].mxu1  ;;  %v222_v15 = vadd.f32 %v220_v10, %v200_v12  ;;  %v141_v21 = vadd.f32 %v266_v20, %v140_v11 }
 0x128   :  { %v143_v16 = vpop.f32.mrb[2].mxu0  ;;  %v203_v17 = vpop.f32.mrb[2].mxu1 }
 0x129   :  { %v288_v18 = vpop.f32.mrb[3].mxu0  ;;  %224 = vrot.lane.b32.xlu0 %v222_v15, %s438_s0  ;;  %v296_v19 = vpop.f32.mrb[3].mxu1  ;;  %v206_v22 = vadd.f32 %v200_v12, %v141_v21 }
 0x12b   :  { %v273_v23 = vmul.f32 -1.442695, %v206_v22 }
 0x12d   :  { %311 = vpow2.f32 %v273_v23 }
 0x137   :  { %v312_v24 = vpop.eup %311 }
 0x138   :  { %v210_v25 = vadd.f32 1.0, %v312_v24 }
 0x13a   :  { %313 = vrcp.f32 %v210_v25 }
 0x144   :  { %v314_v26 = vpop.eup %313 }
 0x19b   :  { %v225_v27 = vpop.permute.xlu0 %224 }
 0x19c   :  { %v227_v28 = vmul.f32 %v314_v26, %v225_v27 }
 0x19e   :  { %229 = vrot.lane.b32.xlu1 %v227_v28, %s438_s0 }
 0x1a2   :  { %235 = vrot.lane.b32.xlu1 %v76_v6, %s438_s0 }
 0x210   :  { %v230_v29 = vpop.permute.xlu1 %229 }
 0x211   :  { %v232_v30 = vadd.f32 %v230_v29, %v141_v21 }
 0x213   :  { %315 = vtanh.f32 %v232_v30 }
 0x214   :  { %v236_v31 = vpop.permute.xlu1 %235 }
 0x21d   :  { %v316_v32 = vpop.eup %315 }
 0x21e   :  { %v238_v33 = vsub.f32 %v316_v32, %v236_v31 }
 0x220   :  { %240 = vrot.lane.b32.xlu0 %v238_v33, %s443_s4 }
 0x292   :  { %v241_v34 = vpop.permute.xlu0 %240 }
 0x293   :  { %v243_v35 = vmul.f32 %v314_v26, %v241_v34 }
 0x295   :  { %245 = vrot.lane.b32.xlu1 %v243_v35, %s443_s4 }
 0x307   :  { %v246_v36 = vpop.permute.xlu1 %245 }
 0x308   :  { %248 = vst.msk [vmem:[#allocation10] sm:$0xff] %vm102_vm1, %v246_v36 }
 0x309   :  { %416 = shalt.err (!%p413_p8)
}
 0x30a   :  { %s417_s27 = scalar_lea.hbm %s563_s6, 128 }
 0x30b   :  { %p418_p9 = scmp.ne.s32.totalorder %s563_s6, %s417_s27  ;;  %p421_p10 = scmp.lt.u32.totalorder %s417_s27, %s563_s6 }
 0x30d   :  { %p423_p11 = pnand %p421_p10, %p418_p9 }
 0x30f   :  { %426 = shalt.err (!%p423_p11)
}
 0x310   :  { %258 = dma.vmem_to_hbm [thread:$0]  %s256_s22, 128, %s563_s6, [#allocation4]  }
 0x311   :  { %433 = dma.done.wait [#allocation4], 128  }
 0x312   :  { %434 = vsyncadd [#allocation4], 4294967168 }
 0x313   :  { %262 = vsyncpa [#allocation3], 1 }
 0x314   :  { %263 = vsyncpa [#allocation6], 1 }
 0x315   :  { %264 = vsyncpa [#allocation9], 1 }
 0x316   :  { %265 = vsyncpa [#allocation4], 1 }

</bundles_post_ra>
